<compile_context>
chip_gen: v7x
topology: tpu7x:2x2x1
jax: 0.10.0
libtpu: 0.0.40
codegen_flags: <defaults>
</compile_context>

<pallas_src>
import functools

import jax
import jax.numpy as jnp
import numpy as np
from jax.experimental import pallas as pl
from jax.experimental.pallas import tpu as pltpu


def _round_up(x, m):
    return ((x + m - 1) // m) * m


# ---------------------------------------------------------------------------
# Q projection: one fused block-diagonal bf16 matmul per row tile, output
# written directly in head-major (h, rows, dkh) layout (no XLA transpose).
# ---------------------------------------------------------------------------
def _q_proj_kernel(x_ref, wT_ref, b_ref, o_ref, *, heads, dh):
    x = x_ref[...].astype(jnp.bfloat16)
    y = jnp.dot(x, wT_ref[...], preferred_element_type=jnp.float32) + b_ref[...]
    for i in range(heads):                       # static per-head lane slices
        o_ref[i] = y[:, i * dh:(i + 1) * dh].astype(o_ref.dtype)


def _project_q(x, wT, b, *, heads, dh, block_rows=512):
    n, d_in = x.shape
    tr = min(block_rows, _round_up(n, 8))
    grid = (pl.cdiv(n, tr),)
    kernel = functools.partial(_q_proj_kernel, heads=heads, dh=dh)
    return pl.pallas_call(
        kernel,
        out_shape=jax.ShapeDtypeStruct((heads, n, dh), jnp.bfloat16),
        grid_spec=pltpu.PrefetchScalarGridSpec(
            num_scalar_prefetch=0,
            grid=grid,
            in_specs=[
                pl.BlockSpec((tr, d_in), lambda i: (i, 0)),
                pl.BlockSpec((d_in, d_in), lambda i: (0, 0)),   # resident bf16 weights
                pl.BlockSpec((1, d_in), lambda i: (0, 0)),      # resident bias
            ],
            out_specs=pl.BlockSpec((heads, tr, dh), lambda i: (0, i, 0)),
        ),
        compiler_params=pltpu.CompilerParams(dimension_semantics=("parallel",)),
        cost_estimate=pl.CostEstimate(
            flops=int(2 * n * d_in * d_in),
            transcendentals=0,
            bytes_accessed=int(4 * n * d_in + 2 * d_in * d_in + 4 * d_in
                               + 2 * n * heads * dh)),
    )(x, wT, b)


# ---------------------------------------------------------------------------
# K + V projections merged into a single pallas_call (same row grid), outputs
# written head-major like the Q projection.
# ---------------------------------------------------------------------------
def _kv_proj_kernel(k_ref, v_ref, wkT_ref, bk_ref, wvT_ref, bv_ref,
                    ok_ref, ov_ref, *, heads, dkh, dvh):
    kx = k_ref[...].astype(jnp.bfloat16)
    vx = v_ref[...].astype(jnp.bfloat16)
    ky = jnp.dot(kx, wkT_ref[...], preferred_element_type=jnp.float32) + bk_ref[...]
    vy = jnp.dot(vx, wvT_ref[...], preferred_element_type=jnp.float32) + bv_ref[...]
    for i in range(heads):
        ok_ref[i] = ky[:, i * dkh:(i + 1) * dkh].astype(ok_ref.dtype)
        ov_ref[i] = vy[:, i * dvh:(i + 1) * dvh].astype(ov_ref.dtype)


def _project_kv(k, v, wkT, bk, wvT, bv, *, heads, dkh, dvh, block_rows=512):
    n = k.shape[0]
    dk_in, dv_in = k.shape[1], v.shape[1]
    tr = min(block_rows, _round_up(n, 8))
    grid = (pl.cdiv(n, tr),)
    kernel = functools.partial(_kv_proj_kernel, heads=heads, dkh=dkh, dvh=dvh)
    return pl.pallas_call(
        kernel,
        out_shape=(jax.ShapeDtypeStruct((heads, n, dkh), jnp.bfloat16),
                   jax.ShapeDtypeStruct((heads, n, dvh), jnp.bfloat16)),
        grid_spec=pltpu.PrefetchScalarGridSpec(
            num_scalar_prefetch=0,
            grid=grid,
            in_specs=[
                pl.BlockSpec((tr, dk_in), lambda i: (i, 0)),
                pl.BlockSpec((tr, dv_in), lambda i: (i, 0)),
                pl.BlockSpec((dk_in, dk_in), lambda i: (0, 0)),
                pl.BlockSpec((1, dk_in), lambda i: (0, 0)),
                pl.BlockSpec((dv_in, dv_in), lambda i: (0, 0)),
                pl.BlockSpec((1, dv_in), lambda i: (0, 0)),
            ],
            out_specs=[
                pl.BlockSpec((heads, tr, dkh), lambda i: (0, i, 0)),
                pl.BlockSpec((heads, tr, dvh), lambda i: (0, i, 0)),
            ],
        ),
        compiler_params=pltpu.CompilerParams(dimension_semantics=("parallel",)),
        cost_estimate=pl.CostEstimate(
            flops=int(2 * n * (dk_in * dk_in + dv_in * dv_in)),
            transcendentals=0,
            bytes_accessed=int(4 * n * (dk_in + dv_in)
                               + 2 * (dk_in * dk_in + dv_in * dv_in)
                               + 2 * n * heads * (dkh + dvh))),
    )(k, v, wkT, bk, wvT, bv)


# ---------------------------------------------------------------------------
# Flash attention: heads on the grid, online softmax over KV tiles,
# f32 scratch, bf16 MXU operands, tail masking only on the last KV tile.
# ---------------------------------------------------------------------------
def _flash_attn_kernel(q_ref, k_ref, v_ref, o_ref, m_sc, l_sc, acc_sc,
                       *, kv_len, block_k):
    kj = pl.program_id(2)
    nk = pl.num_programs(2)

    @pl.when(kj == 0)
    def _():
        m_sc[...] = jnp.full(m_sc.shape, -jnp.inf, jnp.float32)
        l_sc[...] = jnp.zeros(l_sc.shape, jnp.float32)
        acc_sc[...] = jnp.zeros(acc_sc.shape, jnp.float32)

    q = q_ref[0]          # (tq, dkh) bf16; 1/sqrt(dkh) pre-folded into Q proj
    k = k_ref[0]          # (tk, dkh) bf16
    v = v_ref[0]          # (tk, dvh) bf16

    # QK^T without materializing a transpose (contract the dkh dims).
    s = jax.lax.dot_general(q, k, (((1,), (1,)), ((), ())),
                            preferred_element_type=jnp.float32)   # (tq, tk)

    def online_update(s_blk, v_blk):
        m_prev = m_sc[...]
        m_new = jnp.maximum(m_prev, s_blk.max(axis=-1, keepdims=True))
        alpha = jnp.exp(m_prev - m_new)
        p = jnp.exp(s_blk - m_new)
        l_sc[...] = alpha * l_sc[...] + p.sum(axis=-1, keepdims=True)
        acc_sc[...] = alpha * acc_sc[...] + jax.lax.dot_general(
            p.astype(jnp.bfloat16), v_blk, (((1,), (0,)), ((), ())),
            preferred_element_type=jnp.float32)
        m_sc[...] = m_new

    if kv_len % block_k == 0:
        # No padded tail: steady state pays zero masking cost.
        online_update(s, v)
    else:
        @pl.when(kj < nk - 1)
        def _():
            online_update(s, v)

        @pl.when(kj == nk - 1)
        def _():
            # Mask only on the last (partial) KV tile: scores -> -inf,
            # padded V rows -> 0 (guards against stale/NaN VMEM padding).
            col = kj * block_k + jax.lax.broadcasted_iota(jnp.int32, s.shape, 1)
            s_m = jnp.where(col < kv_len, s, -jnp.inf)
            row = kj * block_k + jax.lax.broadcasted_iota(jnp.int32, v.shape, 0)
            v_m = jnp.where(row < kv_len, v, jnp.zeros_like(v))
            online_update(s_m, v_m)

    @pl.when(kj == nk - 1)
    def _():
        inv_l = pl.reciprocal(l_sc[...], approx=True)
        o_ref[0] = (acc_sc[...] * inv_l).astype(o_ref.dtype)


def _flash_attention(qh, kh, vh, *, block_q=256, block_k=256):
    h, nq, dkh = qh.shape
    _, nkv, dvh = vh.shape
    tq = min(block_q, _round_up(nq, 8))
    tk = min(block_k, _round_up(nkv, 8))
    grid = (h, pl.cdiv(nq, tq), pl.cdiv(nkv, tk))
    kernel = functools.partial(_flash_attn_kernel, kv_len=nkv, block_k=tk)
    return pl.pallas_call(
        kernel,
        out_shape=jax.ShapeDtypeStruct((h, nq, dvh), jnp.bfloat16),
        grid_spec=pltpu.PrefetchScalarGridSpec(
            num_scalar_prefetch=0,
            grid=grid,
            in_specs=[
                pl.BlockSpec((1, tq, dkh), lambda hd, qi, kj: (hd, qi, 0)),
                pl.BlockSpec((1, tk, dkh), lambda hd, qi, kj: (hd, kj, 0)),
                pl.BlockSpec((1, tk, dvh), lambda hd, qi, kj: (hd, kj, 0)),
            ],
            out_specs=pl.BlockSpec((1, tq, dvh), lambda hd, qi, kj: (hd, qi, 0)),
            scratch_shapes=[
                pltpu.VMEM((tq, 1), jnp.float32),     # running max
                pltpu.VMEM((tq, 1), jnp.float32),     # running denominator
                pltpu.VMEM((tq, dvh), jnp.float32),   # f32 accumulator
            ],
        ),
        compiler_params=pltpu.CompilerParams(
            dimension_semantics=("parallel", "parallel", "arbitrary")),
        cost_estimate=pl.CostEstimate(
            flops=int(2 * h * nq * nkv * (dkh + dvh)),
            transcendentals=int(h * nq * nkv),
            bytes_accessed=int(2 * h * (nq * dkh + nkv * dkh + nkv * dvh
                                        + nq * dvh))),
    )(qh, kh, vh)


# ---------------------------------------------------------------------------
# Output projection: consumes the head-major attention output directly
# (out = sum_i oh[i] @ WoT[i] + bo), so no XLA transpose/concatenate.
# ---------------------------------------------------------------------------
def _out_proj_kernel(x_ref, wT_ref, b_ref, o_ref, *, heads):
    acc = jnp.dot(x_ref[0], wT_ref[0], preferred_element_type=jnp.float32)
    for i in range(1, heads):
        acc = acc + jnp.dot(x_ref[i], wT_ref[i],
                            preferred_element_type=jnp.float32)
    o_ref[...] = (acc + b_ref[...]).astype(o_ref.dtype)


def _out_project(oh, woT_heads, bo, *, block_rows=512):
    h, nq, dvh = oh.shape
    d_model = woT_heads.shape[-1]
    tr = min(block_rows, _round_up(nq, 8))
    grid = (pl.cdiv(nq, tr),)
    kernel = functools.partial(_out_proj_kernel, heads=h)
    return pl.pallas_call(
        kernel,
        out_shape=jax.ShapeDtypeStruct((nq, d_model), jnp.float32),
        grid_spec=pltpu.PrefetchScalarGridSpec(
            num_scalar_prefetch=0,
            grid=grid,
            in_specs=[
                pl.BlockSpec((h, tr, dvh), lambda i: (0, i, 0)),
                pl.BlockSpec((h, dvh, d_model), lambda i: (0, 0, 0)),
                pl.BlockSpec((1, d_model), lambda i: (0, 0)),
            ],
            out_specs=pl.BlockSpec((tr, d_model), lambda i: (i, 0)),
        ),
        compiler_params=pltpu.CompilerParams(dimension_semantics=("parallel",)),
        cost_estimate=pl.CostEstimate(
            flops=int(2 * nq * h * dvh * d_model),
            transcendentals=0,
            bytes_accessed=int(2 * nq * h * dvh + 2 * h * dvh * d_model
                               + 4 * d_model + 4 * nq * d_model)),
    )(oh, woT_heads, bo)


# ---------------------------------------------------------------------------
# Module wrapper
# ---------------------------------------------------------------------------
class MultiHeadAttentionPallas:
    """Deterministically-initialized Pallas port of the PyTorch module."""

    def __init__(self, h, d_k, d_v, key):
        self.h = h
        self.dk_h = d_k // h          # features per head for Q/K
        self.dv_h = d_v // h          # features per head for V
        self.d_model = h * self.dk_h  # final output width

        ks = jax.random.split(key, 4)

        def init_linear(k, out_f, in_f, n_stack):
            # torch.nn.Linear default init: U(-1/sqrt(fan_in), 1/sqrt(fan_in))
            bound = 1.0 / float(in_f) ** 0.5
            kw, kb = jax.random.split(k)
            w = jax.random.uniform(kw, (n_stack, out_f, in_f), jnp.float32,
                                   -bound, bound)
            b = jax.random.uniform(kb, (n_stack, out_f), jnp.float32,
                                   -bound, bound)
            return w, b

        # Per-head parameter stacks (torch Linear convention: y = x W^T + b).
        self.wq, self.bq = init_linear(ks[0], self.dk_h, self.dk_h, h)
        self.wk, self.bk = init_linear(ks[1], self.dk_h, self.dk_h, h)
        self.wv, self.bv = init_linear(ks[2], self.dv_h, self.dv_h, h)
        wo, bo = init_linear(ks[3], self.d_model, h * self.dv_h, 1)
        self.wo = wo[0]                    # (d_model, h*dv_h)
        self.bo = bo                       # (1, d_model), f32

        def block_diag_T(w_stack):
            # (h, out, in) -> block-diagonal of per-head W^T, (h*in, h*out)
            w_np = np.asarray(w_stack)
            n, out_f, in_f = w_np.shape
            bd = np.zeros((n * in_f, n * out_f), np.float32)
            for i in range(n):
                bd[i * in_f:(i + 1) * in_f,
                   i * out_f:(i + 1) * out_f] = w_np[i].T
            return bd

        scale = 1.0 / float(self.dk_h) ** 0.5
        # Fused bf16 weights (half HBM/VMEM); 1/sqrt(dkh) folded into Q proj.
        self.wqT_fused = jnp.asarray(block_diag_T(self.wq) * scale, jnp.bfloat16)
        self.bq_fused = self.bq.reshape(1, -1) * scale            # f32
        self.wkT_fused = jnp.asarray(block_diag_T(self.wk), jnp.bfloat16)
        self.bk_fused = self.bk.reshape(1, -1)                    # f32
        self.wvT_fused = jnp.asarray(block_diag_T(self.wv), jnp.bfloat16)
        self.bv_fused = self.bv.reshape(1, -1)                    # f32
        # Per-head slices of Wo^T, (h, dv_h, d_model), bf16.
        self.woT_heads = jnp.asarray(
            np.asarray(self.wo).T.reshape(h, self.dv_h, self.d_model),
            jnp.bfloat16)

    def __call__(self, Q, K, V):
        # The reference module casts inputs to float32; softmax statistics and
        # all matmul accumulation stay in f32, MXU operands are bf16.
        Q = Q.astype(jnp.float32)
        K = K.astype(jnp.float32)
        V = V.astype(jnp.float32)
        dq_used, dv_used = self.h * self.dk_h, self.h * self.dv_h
        if Q.shape[1] != dq_used:
            Q = Q[:, :dq_used]
        if K.shape[1] != dq_used:
            K = K[:, :dq_used]
        if V.shape[1] != dv_used:
            V = V[:, :dv_used]

        # Fused projections, written head-major -> no XLA transposes.
        qh = _project_q(Q, self.wqT_fused, self.bq_fused,
                        heads=self.h, dh=self.dk_h)               # (h, nq, dkh) bf16
        kh, vh = _project_kv(K, V, self.wkT_fused, self.bk_fused,
                             self.wvT_fused, self.bv_fused,
                             heads=self.h, dkh=self.dk_h, dvh=self.dv_h)

        oh = _flash_attention(qh, kh, vh)                          # (h, nq, dvh) bf16

        return _out_project(oh, self.woT_heads, self.bo)           # (nq, d_model) f32


# ---------------------------------------------------------------------------
# Pure-JAX reference (mirrors the PyTorch forward) for correctness checking.
# ---------------------------------------------------------------------------
def _reference_forward(mha, Q, K, V):
    Q = Q.astype(jnp.float32)
    K = K.astype(jnp.float32)
    V = V.astype(jnp.float32)
    outs = []
    for i in range(mha.h):
        qs = Q[:, i * mha.dk_h:(i + 1) * mha.dk_h]
        ks = K[:, i * mha.dk_h:(i + 1) * mha.dk_h]
        vs = V[:, i * mha.dv_h:(i + 1) * mha.dv_h]
        qp = qs @ mha.wq[i].T + mha.bq[i]
        kp = ks @ mha.wk[i].T + mha.bk[i]
        vp = vs @ mha.wv[i].T + mha.bv[i]
        s = (qp @ kp.T) / jnp.sqrt(jnp.float32(mha.dk_h))
        p = jax.nn.softmax(s, axis=-1)
        outs.append(p @ vp)
    concat = jnp.concatenate(outs, axis=1)
    return concat @ mha.wo.T + mha.bo


if __name__ == "__main__":
    key = jax.random.PRNGKey(0)
    kq, kk, kv, kp = jax.random.split(key, 4)

    h, d_k, d_v = 2, 32, 32
    mha = MultiHeadAttentionPallas(h, d_k, d_v, kp)
    fwd = jax.jit(lambda q, k, v: mha(q, k, v))

    # (n_queries, n_keys): tiny single-tile case, multi-tile case with a
    # masked KV tail (384 % 256 != 0), and an asymmetric nq != nkv case.
    for nq, nkv in ((8, 8), (384, 384), (128, 384)):
        Q = jax.random.normal(kq, (nq, d_k), jnp.float32)
        K = jax.random.normal(kk, (nkv, d_k), jnp.float32)
        V = jax.random.normal(kv, (nkv, d_v), jnp.float32)

        out = fwd(Q, K, V)
        jax.block_until_ready(out)

        assert out.shape == (nq, mha.d_model), out.shape
        assert out.dtype == jnp.float32
        ref = _reference_forward(mha, Q, K, V)
        np.testing.assert_allclose(np.asarray(out), np.asarray(ref),
                                   rtol=2e-2, atol=2e-2)

    print("KERNEL_OK")
</pallas_src>

<mosaic_0001>
module attributes {stable_mosaic.version = 11 : i64} {
  func.func @_q_proj_kernel(%arg0: i32, %arg1: memref<8x32xf32, #tpu.memory_space<vmem>>, %arg2: memref<32x32xbf16, #tpu.memory_space<vmem>>, %arg3: memref<1x32xf32, #tpu.memory_space<vmem>>, %arg4: memref<2x8x16xbf16, #tpu.memory_space<vmem>>) attributes {dimension_semantics = [#tpu.dimension_semantics<parallel>], iteration_bounds = array<i64: 1>, scalar_prefetch = 0 : i64, scratch_operands = 0 : i64, tpu.core_type = #tpu.core_type<tc>, window_params = [{transform_indices = @transform_0, window_bounds = array<i64: 8, 32>}, {pipeline_mode = #tpu.pipeline_mode<synchronous>, transform_indices = @transform_1, window_bounds = array<i64: 32, 32>}, {pipeline_mode = #tpu.pipeline_mode<synchronous>, transform_indices = @transform_2, window_bounds = array<i64: 1, 32>}, {transform_indices = @transform_3, window_bounds = array<i64: 2, 8, 16>}]} {
    %c0 = arith.constant 0 : index
    %c0_0 = arith.constant 0 : index
    %0 = vector.load %arg1[%c0, %c0_0] : memref<8x32xf32, #tpu.memory_space<vmem>>, vector<8x32xf32>
    %1 = arith.truncf %0 : vector<8x32xf32> to vector<8x32xbf16>
    %c0_1 = arith.constant 0 : index
    %c0_2 = arith.constant 0 : index
    %2 = vector.load %arg2[%c0_1, %c0_2] : memref<32x32xbf16, #tpu.memory_space<vmem>>, vector<32x32xbf16>
    %cst = arith.constant dense<0.000000e+00> : vector<8x32xf32>
    %3 = tpu.matmul %1, %2, %cst {dimension_numbers = #tpu.dot_dimension_numbers<[1], [0], [0], [1], [0, 0, 1, 1], [], []>} : vector<8x32xbf16>, vector<32x32xbf16>, vector<8x32xf32> -> vector<8x32xf32>
    %c0_3 = arith.constant 0 : index
    %c0_4 = arith.constant 0 : index
    %4 = vector.load %arg3[%c0_3, %c0_4] : memref<1x32xf32, #tpu.memory_space<vmem>>, vector<1x32xf32>
    %5 = vector.broadcast %4 : vector<1x32xf32> to vector<8x32xf32>
    %6 = arith.addf %3, %5 : vector<8x32xf32>
    %7 = vector.extract_strided_slice %6 {offsets = [0, 0], sizes = [8, 16], strides = [1, 1]} : vector<8x32xf32> to vector<8x16xf32>
    %8 = arith.truncf %7 : vector<8x16xf32> to vector<8x16xbf16>
    %c0_5 = arith.constant 0 : index
    %c0_6 = arith.constant 0 : index
    %c0_7 = arith.constant 0 : index
    %9 = vector.load %arg4[%c0_5, %c0_6, %c0_7] : memref<2x8x16xbf16, #tpu.memory_space<vmem>>, vector<1x8x16xbf16>
    %10 = vector.shape_cast %9 : vector<1x8x16xbf16> to vector<8x16xbf16>
    %11 = vector.shape_cast %8 : vector<8x16xbf16> to vector<1x8x16xbf16>
    tpu.vector_store %arg4[%c0_5, %c0_6, %c0_7], %11 {strides = array<i32>} : memref<2x8x16xbf16, #tpu.memory_space<vmem>>, vector<1x8x16xbf16>,
    %12 = vector.extract_strided_slice %6 {offsets = [0, 16], sizes = [8, 16], strides = [1, 1]} : vector<8x32xf32> to vector<8x16xf32>
    %13 = arith.truncf %12 : vector<8x16xf32> to vector<8x16xbf16>
    %c1 = arith.constant 1 : index
    %c0_8 = arith.constant 0 : index
    %c0_9 = arith.constant 0 : index
    %14 = vector.load %arg4[%c1, %c0_8, %c0_9] : memref<2x8x16xbf16, #tpu.memory_space<vmem>>, vector<1x8x16xbf16>
    %15 = vector.shape_cast %14 : vector<1x8x16xbf16> to vector<8x16xbf16>
    %16 = vector.shape_cast %13 : vector<8x16xbf16> to vector<1x8x16xbf16>
    tpu.vector_store %arg4[%c1, %c0_8, %c0_9], %16 {strides = array<i32>} : memref<2x8x16xbf16, #tpu.memory_space<vmem>>, vector<1x8x16xbf16>,
    return
  }
  func.func @transform_0(%arg0: i32) -> (i32, i32) {
    %c0_i32 = arith.constant 0 : i32
    %c0_i32_0 = arith.constant 0 : i32
    return %arg0, %c0_i32 : i32, i32
  }
  func.func @transform_1(%arg0: i32) -> (i32, i32) {
    %c0_i32 = arith.constant 0 : i32
    %c0_i32_0 = arith.constant 0 : i32
    %c0_i32_1 = arith.constant 0 : i32
    return %c0_i32, %c0_i32_0 : i32, i32
  }
  func.func @transform_2(%arg0: i32) -> (i32, i32) {
    %c0_i32 = arith.constant 0 : i32
    %c0_i32_0 = arith.constant 0 : i32
    %c0_i32_1 = arith.constant 0 : i32
    return %c0_i32, %c0_i32_0 : i32, i32
  }
  func.func @transform_3(%arg0: i32) -> (i32, i32, i32) {
    %c0_i32 = arith.constant 0 : i32
    %c0_i32_0 = arith.constant 0 : i32
    %c0_i32_1 = arith.constant 0 : i32
    return %c0_i32, %arg0, %c0_i32_0 : i32, i32, i32
  }
}

module attributes {stable_mosaic.version = 11 : i64} {
  func.func @_out_proj_kernel(%arg0: i32, %arg1: memref<2x8x16xbf16, #tpu.memory_space<vmem>>, %arg2: memref<2x16x32xbf16, #tpu.memory_space<vmem>>, %arg3: memref<1x32xf32, #tpu.memory_space<vmem>>, %arg4: memref<8x32xf32, #tpu.memory_space<vmem>>) attributes {dimension_semantics = [#tpu.dimension_semantics<parallel>], iteration_bounds = array<i64: 1>, scalar_prefetch = 0 : i64, scratch_operands = 0 : i64, tpu.core_type = #tpu.core_type<tc>, window_params = [{transform_indices = @transform_0, window_bounds = array<i64: 2, 8, 16>}, {pipeline_mode = #tpu.pipeline_mode<synchronous>, transform_indices = @transform_1, window_bounds = array<i64: 2, 16, 32>}, {pipeline_mode = #tpu.pipeline_mode<synchronous>, transform_indices = @transform_2, window_bounds = array<i64: 1, 32>}, {transform_indices = @transform_3, window_bounds = array<i64: 8, 32>}]} {
    %c0 = arith.constant 0 : index
    %c0_0 = arith.constant 0 : index
    %c0_1 = arith.constant 0 : index
    %0 = vector.load %arg1[%c0, %c0_0, %c0_1] : memref<2x8x16xbf16, #tpu.memory_space<vmem>>, vector<1x8x16xbf16>
    %1 = vector.shape_cast %0 : vector<1x8x16xbf16> to vector<8x16xbf16>
    %c0_2 = arith.constant 0 : index
    %c0_3 = arith.constant 0 : index
    %c0_4 = arith.constant 0 : index
    %2 = vector.load %arg2[%c0_2, %c0_3, %c0_4] : memref<2x16x32xbf16, #tpu.memory_space<vmem>>, vector<1x16x32xbf16>
    %3 = vector.shape_cast %2 : vector<1x16x32xbf16> to vector<16x32xbf16>
    %cst = arith.constant dense<0.000000e+00> : vector<8x32xf32>
    %4 = tpu.matmul %1, %3, %cst {dimension_numbers = #tpu.dot_dimension_numbers<[1], [0], [0], [1], [0, 0, 1, 1], [], []>} : vector<8x16xbf16>, vector<16x32xbf16>, vector<8x32xf32> -> vector<8x32xf32>
    %c1 = arith.constant 1 : index
    %c0_5 = arith.constant 0 : index
    %c0_6 = arith.constant 0 : index
    %5 = vector.load %arg1[%c1, %c0_5, %c0_6] : memref<2x8x16xbf16, #tpu.memory_space<vmem>>, vector<1x8x16xbf16>
    %6 = vector.shape_cast %5 : vector<1x8x16xbf16> to vector<8x16xbf16>
    %c1_7 = arith.constant 1 : index
    %c0_8 = arith.constant 0 : index
    %c0_9 = arith.constant 0 : index
    %7 = vector.load %arg2[%c1_7, %c0_8, %c0_9] : memref<2x16x32xbf16, #tpu.memory_space<vmem>>, vector<1x16x32xbf16>
    %8 = vector.shape_cast %7 : vector<1x16x32xbf16> to vector<16x32xbf16>
    %cst_10 = arith.constant dense<0.000000e+00> : vector<8x32xf32>
    %9 = tpu.matmul %6, %8, %cst_10 {dimension_numbers = #tpu.dot_dimension_numbers<[1], [0], [0], [1], [0, 0, 1, 1], [], []>} : vector<8x16xbf16>, vector<16x32xbf16>, vector<8x32xf32> -> vector<8x32xf32>
    %10 = arith.addf %4, %9 : vector<8x32xf32>
    %c0_11 = arith.constant 0 : index
    %c0_12 = arith.constant 0 : index
    %11 = vector.load %arg3[%c0_11, %c0_12] : memref<1x32xf32, #tpu.memory_space<vmem>>, vector<1x32xf32>
    %12 = vector.broadcast %11 : vector<1x32xf32> to vector<8x32xf32>
    %13 = arith.addf %10, %12 : vector<8x32xf32>
    %c0_13 = arith.constant 0 : index
    %c0_14 = arith.constant 0 : index
    %14 = vector.load %arg4[%c0_13, %c0_14] : memref<8x32xf32, #tpu.memory_space<vmem>>, vector<8x32xf32>
    tpu.vector_store %arg4[%c0_13, %c0_14], %13 {strides = array<i32>} : memref<8x32xf32, #tpu.memory_space<vmem>>, vector<8x32xf32>,
    return
  }
  func.func @transform_0(%arg0: i32) -> (i32, i32, i32) {
    %c0_i32 = arith.constant 0 : i32
    %c0_i32_0 = arith.constant 0 : i32
    %c0_i32_1 = arith.constant 0 : i32
    return %c0_i32, %arg0, %c0_i32_0 : i32, i32, i32
  }
  func.func @transform_1(%arg0: i32) -> (i32, i32, i32) {
    %c0_i32 = arith.constant 0 : i32
    %c0_i32_0 = arith.constant 0 : i32
    %c0_i32_1 = arith.constant 0 : i32
    %c0_i32_2 = arith.constant 0 : i32
    return %c0_i32, %c0_i32_0, %c0_i32_1 : i32, i32, i32
  }
  func.func @transform_2(%arg0: i32) -> (i32, i32) {
    %c0_i32 = arith.constant 0 : i32
    %c0_i32_0 = arith.constant 0 : i32
    %c0_i32_1 = arith.constant 0 : i32
    return %c0_i32, %c0_i32_0 : i32, i32
  }
  func.func @transform_3(%arg0: i32) -> (i32, i32) {
    %c0_i32 = arith.constant 0 : i32
    %c0_i32_0 = arith.constant 0 : i32
    return %arg0, %c0_i32 : i32, i32
  }
}

module attributes {stable_mosaic.version = 11 : i64} {
  func.func @_kv_proj_kernel(%arg0: i32, %arg1: memref<8x32xf32, #tpu.memory_space<vmem>>, %arg2: memref<8x32xf32, #tpu.memory_space<vmem>>, %arg3: memref<32x32xbf16, #tpu.memory_space<vmem>>, %arg4: memref<1x32xf32, #tpu.memory_space<vmem>>, %arg5: memref<32x32xbf16, #tpu.memory_space<vmem>>, %arg6: memref<1x32xf32, #tpu.memory_space<vmem>>, %arg7: memref<2x8x16xbf16, #tpu.memory_space<vmem>>, %arg8: memref<2x8x16xbf16, #tpu.memory_space<vmem>>) attributes {dimension_semantics = [#tpu.dimension_semantics<parallel>], iteration_bounds = array<i64: 1>, scalar_prefetch = 0 : i64, scratch_operands = 0 : i64, tpu.core_type = #tpu.core_type<tc>, window_params = [{transform_indices = @transform_0, window_bounds = array<i64: 8, 32>}, {transform_indices = @transform_1, window_bounds = array<i64: 8, 32>}, {pipeline_mode = #tpu.pipeline_mode<synchronous>, transform_indices = @transform_2, window_bounds = array<i64: 32, 32>}, {pipeline_mode = #tpu.pipeline_mode<synchronous>, transform_indices = @transform_3, window_bounds = array<i64: 1, 32>}, {pipeline_mode = #tpu.pipeline_mode<synchronous>, transform_indices = @transform_4, window_bounds = array<i64: 32, 32>}, {pipeline_mode = #tpu.pipeline_mode<synchronous>, transform_indices = @transform_5, window_bounds = array<i64: 1, 32>}, {transform_indices = @transform_6, window_bounds = array<i64: 2, 8, 16>}, {transform_indices = @transform_7, window_bounds = array<i64: 2, 8, 16>}]} {
    %c0 = arith.constant 0 : index
    %c0_0 = arith.constant 0 : index
    %0 = vector.load %arg1[%c0, %c0_0] : memref<8x32xf32, #tpu.memory_space<vmem>>, vector<8x32xf32>
    %1 = arith.truncf %0 : vector<8x32xf32> to vector<8x32xbf16>
    %c0_1 = arith.constant 0 : index
    %c0_2 = arith.constant 0 : index
    %2 = vector.load %arg2[%c0_1, %c0_2] : memref<8x32xf32, #tpu.memory_space<vmem>>, vector<8x32xf32>
    %3 = arith.truncf %2 : vector<8x32xf32> to vector<8x32xbf16>
    %c0_3 = arith.constant 0 : index
    %c0_4 = arith.constant 0 : index
    %4 = vector.load %arg3[%c0_3, %c0_4] : memref<32x32xbf16, #tpu.memory_space<vmem>>, vector<32x32xbf16>
    %cst = arith.constant dense<0.000000e+00> : vector<8x32xf32>
    %5 = tpu.matmul %1, %4, %cst {dimension_numbers = #tpu.dot_dimension_numbers<[1], [0], [0], [1], [0, 0, 1, 1], [], []>} : vector<8x32xbf16>, vector<32x32xbf16>, vector<8x32xf32> -> vector<8x32xf32>
    %c0_5 = arith.constant 0 : index
    %c0_6 = arith.constant 0 : index
    %6 = vector.load %arg4[%c0_5, %c0_6] : memref<1x32xf32, #tpu.memory_space<vmem>>, vector<1x32xf32>
    %7 = vector.broadcast %6 : vector<1x32xf32> to vector<8x32xf32>
    %8 = arith.addf %5, %7 : vector<8x32xf32>
    %c0_7 = arith.constant 0 : index
    %c0_8 = arith.constant 0 : index
    %9 = vector.load %arg5[%c0_7, %c0_8] : memref<32x32xbf16, #tpu.memory_space<vmem>>, vector<32x32xbf16>
    %cst_9 = arith.constant dense<0.000000e+00> : vector<8x32xf32>
    %10 = tpu.matmul %3, %9, %cst_9 {dimension_numbers = #tpu.dot_dimension_numbers<[1], [0], [0], [1], [0, 0, 1, 1], [], []>} : vector<8x32xbf16>, vector<32x32xbf16>, vector<8x32xf32> -> vector<8x32xf32>
    %c0_10 = arith.constant 0 : index
    %c0_11 = arith.constant 0 : index
    %11 = vector.load %arg6[%c0_10, %c0_11] : memref<1x32xf32, #tpu.memory_space<vmem>>, vector<1x32xf32>
    %12 = vector.broadcast %11 : vector<1x32xf32> to vector<8x32xf32>
    %13 = arith.addf %10, %12 : vector<8x32xf32>
    %14 = vector.extract_strided_slice %8 {offsets = [0, 0], sizes = [8, 16], strides = [1, 1]} : vector<8x32xf32> to vector<8x16xf32>
    %15 = arith.truncf %14 : vector<8x16xf32> to vector<8x16xbf16>
    %c0_12 = arith.constant 0 : index
    %c0_13 = arith.constant 0 : index
    %c0_14 = arith.constant 0 : index
    %16 = vector.load %arg7[%c0_12, %c0_13, %c0_14] : memref<2x8x16xbf16, #tpu.memory_space<vmem>>, vector<1x8x16xbf16>
    %17 = vector.shape_cast %16 : vector<1x8x16xbf16> to vector<8x16xbf16>
    %18 = vector.shape_cast %15 : vector<8x16xbf16> to vector<1x8x16xbf16>
    tpu.vector_store %arg7[%c0_12, %c0_13, %c0_14], %18 {strides = array<i32>} : memref<2x8x16xbf16, #tpu.memory_space<vmem>>, vector<1x8x16xbf16>,
    %19 = vector.extract_strided_slice %13 {offsets = [0, 0], sizes = [8, 16], strides = [1, 1]} : vector<8x32xf32> to vector<8x16xf32>
    %20 = arith.truncf %19 : vector<8x16xf32> to vector<8x16xbf16>
    %c0_15 = arith.constant 0 : index
    %c0_16 = arith.constant 0 : index
    %c0_17 = arith.constant 0 : index
    %21 = vector.load %arg8[%c0_15, %c0_16, %c0_17] : memref<2x8x16xbf16, #tpu.memory_space<vmem>>, vector<1x8x16xbf16>
    %22 = vector.shape_cast %21 : vector<1x8x16xbf16> to vector<8x16xbf16>
    %23 = vector.shape_cast %20 : vector<8x16xbf16> to vector<1x8x16xbf16>
    tpu.vector_store %arg8[%c0_15, %c0_16, %c0_17], %23 {strides = array<i32>} : memref<2x8x16xbf16, #tpu.memory_space<vmem>>, vector<1x8x16xbf16>,
    %24 = vector.extract_strided_slice %8 {offsets = [0, 16], sizes = [8, 16], strides = [1, 1]} : vector<8x32xf32> to vector<8x16xf32>
    %25 = arith.truncf %24 : vector<8x16xf32> to vector<8x16xbf16>
    %c1 = arith.constant 1 : index
    %c0_18 = arith.constant 0 : index
    %c0_19 = arith.constant 0 : index
    %26 = vector.load %arg7[%c1, %c0_18, %c0_19] : memref<2x8x16xbf16, #tpu.memory_space<vmem>>, vector<1x8x16xbf16>
    %27 = vector.shape_cast %26 : vector<1x8x16xbf16> to vector<8x16xbf16>
    %28 = vector.shape_cast %25 : vector<8x16xbf16> to vector<1x8x16xbf16>
    tpu.vector_store %arg7[%c1, %c0_18, %c0_19], %28 {strides = array<i32>} : memref<2x8x16xbf16, #tpu.memory_space<vmem>>, vector<1x8x16xbf16>,
    %29 = vector.extract_strided_slice %13 {offsets = [0, 16], sizes = [8, 16], strides = [1, 1]} : vector<8x32xf32> to vector<8x16xf32>
    %30 = arith.truncf %29 : vector<8x16xf32> to vector<8x16xbf16>
    %c1_20 = arith.constant 1 : index
    %c0_21 = arith.constant 0 : index
    %c0_22 = arith.constant 0 : index
    %31 = vector.load %arg8[%c1_20, %c0_21, %c0_22] : memref<2x8x16xbf16, #tpu.memory_space<vmem>>, vector<1x8x16xbf16>
    %32 = vector.shape_cast %31 : vector<1x8x16xbf16> to vector<8x16xbf16>
    %33 = vector.shape_cast %30 : vector<8x16xbf16> to vector<1x8x16xbf16>
    tpu.vector_store %arg8[%c1_20, %c0_21, %c0_22], %33 {strides = array<i32>} : memref<2x8x16xbf16, #tpu.memory_space<vmem>>, vector<1x8x16xbf16>,
    return
  }
  func.func @transform_0(%arg0: i32) -> (i32, i32) {
    %c0_i32 = arith.constant 0 : i32
    %c0_i32_0 = arith.constant 0 : i32
    return %arg0, %c0_i32 : i32, i32
  }
  func.func @transform_1(%arg0: i32) -> (i32, i32) {
    %c0_i32 = arith.constant 0 : i32
    %c0_i32_0 = arith.constant 0 : i32
    return %arg0, %c0_i32 : i32, i32
  }
  func.func @transform_2(%arg0: i32) -> (i32, i32) {
    %c0_i32 = arith.constant 0 : i32
    %c0_i32_0 = arith.constant 0 : i32
    %c0_i32_1 = arith.constant 0 : i32
    return %c0_i32, %c0_i32_0 : i32, i32
  }
  func.func @transform_3(%arg0: i32) -> (i32, i32) {
    %c0_i32 = arith.constant 0 : i32
    %c0_i32_0 = arith.constant 0 : i32
    %c0_i32_1 = arith.constant 0 : i32
    return %c0_i32, %c0_i32_0 : i32, i32
  }
  func.func @transform_4(%arg0: i32) -> (i32, i32) {
    %c0_i32 = arith.constant 0 : i32
    %c0_i32_0 = arith.constant 0 : i32
    %c0_i32_1 = arith.constant 0 : i32
    return %c0_i32, %c0_i32_0 : i32, i32
  }
  func.func @transform_5(%arg0: i32) -> (i32, i32) {
    %c0_i32 = arith.constant 0 : i32
    %c0_i32_0 = arith.constant 0 : i32
    %c0_i32_1 = arith.constant 0 : i32
    return %c0_i32, %c0_i32_0 : i32, i32
  }
  func.func @transform_6(%arg0: i32) -> (i32, i32, i32) {
    %c0_i32 = arith.constant 0 : i32
    %c0_i32_0 = arith.constant 0 : i32
    %c0_i32_1 = arith.constant 0 : i32
    return %c0_i32, %arg0, %c0_i32_0 : i32, i32, i32
  }
  func.func @transform_7(%arg0: i32) -> (i32, i32, i32) {
    %c0_i32 = arith.constant 0 : i32
    %c0_i32_0 = arith.constant 0 : i32
    %c0_i32_1 = arith.constant 0 : i32
    return %c0_i32, %arg0, %c0_i32_0 : i32, i32, i32
  }
}

module attributes {stable_mosaic.version = 11 : i64} {
  func.func @_flash_attn_kernel(%arg0: i32, %arg1: i32, %arg2: i32, %arg3: memref<1x8x16xbf16, #tpu.memory_space<vmem>>, %arg4: memref<1x8x16xbf16, #tpu.memory_space<vmem>>, %arg5: memref<1x8x16xbf16, #tpu.memory_space<vmem>>, %arg6: memref<1x8x16xbf16, #tpu.memory_space<vmem>>, %arg7: memref<8x1xf32, #tpu.memory_space<vmem>>, %arg8: memref<8x1xf32, #tpu.memory_space<vmem>>, %arg9: memref<8x16xf32, #tpu.memory_space<vmem>>) attributes {dimension_semantics = [#tpu.dimension_semantics<parallel>, #tpu.dimension_semantics<parallel>, #tpu.dimension_semantics<arbitrary>], iteration_bounds = array<i64: 2, 1, 1>, scalar_prefetch = 0 : i64, scratch_operands = 3 : i64, tpu.core_type = #tpu.core_type<tc>, window_params = [{transform_indices = @transform_0, window_bounds = array<i64: 1, 8, 16>}, {transform_indices = @transform_1, window_bounds = array<i64: 1, 8, 16>}, {transform_indices = @transform_2, window_bounds = array<i64: 1, 8, 16>}, {transform_indices = @transform_3, window_bounds = array<i64: 1, 8, 16>}]} {
    %c0_i32 = arith.constant 0 : i32
    %0 = arith.cmpi eq, %arg2, %c0_i32 : i32
    %1 = arith.extui %0 : i1 to i32
    %c0_i32_0 = arith.constant 0 : i32
    %2 = arith.cmpi ne, %1, %c0_i32_0 : i32
    scf.if %2 {
      %cst_26 = arith.constant 0xFF800000 : f32
      %36 = vector.broadcast %cst_26 : f32 to vector<8x1xf32>
      %c0_27 = arith.constant 0 : index
      %c0_28 = arith.constant 0 : index
      %37 = vector.load %arg7[%c0_27, %c0_28] : memref<8x1xf32, #tpu.memory_space<vmem>>, vector<8x1xf32>
      tpu.vector_store %arg7[%c0_27, %c0_28], %36 {strides = array<i32>} : memref<8x1xf32, #tpu.memory_space<vmem>>, vector<8x1xf32>,
      %cst_29 = arith.constant 0.000000e+00 : f32
      %38 = vector.broadcast %cst_29 : f32 to vector<8x1xf32>
      %c0_30 = arith.constant 0 : index
      %c0_31 = arith.constant 0 : index
      %39 = vector.load %arg8[%c0_30, %c0_31] : memref<8x1xf32, #tpu.memory_space<vmem>>, vector<8x1xf32>
      tpu.vector_store %arg8[%c0_30, %c0_31], %38 {strides = array<i32>} : memref<8x1xf32, #tpu.memory_space<vmem>>, vector<8x1xf32>,
      %cst_32 = arith.constant 0.000000e+00 : f32
      %40 = vector.broadcast %cst_32 : f32 to vector<8x16xf32>
      %c0_33 = arith.constant 0 : index
      %c0_34 = arith.constant 0 : index
      %41 = vector.load %arg9[%c0_33, %c0_34] : memref<8x16xf32, #tpu.memory_space<vmem>>, vector<8x16xf32>
      tpu.vector_store %arg9[%c0_33, %c0_34], %40 {strides = array<i32>} : memref<8x16xf32, #tpu.memory_space<vmem>>, vector<8x16xf32>,
    } else {
    }
    %c0 = arith.constant 0 : index
    %c0_1 = arith.constant 0 : index
    %c0_2 = arith.constant 0 : index
    %3 = vector.load %arg3[%c0, %c0_1, %c0_2] : memref<1x8x16xbf16, #tpu.memory_space<vmem>>, vector<1x8x16xbf16>
    %4 = vector.shape_cast %3 : vector<1x8x16xbf16> to vector<8x16xbf16>
    %c0_3 = arith.constant 0 : index
    %c0_4 = arith.constant 0 : index
    %c0_5 = arith.constant 0 : index
    %5 = vector.load %arg4[%c0_3, %c0_4, %c0_5] : memref<1x8x16xbf16, #tpu.memory_space<vmem>>, vector<1x8x16xbf16>
    %6 = vector.shape_cast %5 : vector<1x8x16xbf16> to vector<8x16xbf16>
    %c0_6 = arith.constant 0 : index
    %c0_7 = arith.constant 0 : index
    %c0_8 = arith.constant 0 : index
    %7 = vector.load %arg5[%c0_6, %c0_7, %c0_8] : memref<1x8x16xbf16, #tpu.memory_space<vmem>>, vector<1x8x16xbf16>
    %8 = vector.shape_cast %7 : vector<1x8x16xbf16> to vector<8x16xbf16>
    %cst = arith.constant dense<0.000000e+00> : vector<8x8xf32>
    %9 = tpu.matmul %4, %6, %cst {dimension_numbers = #tpu.dot_dimension_numbers<[1], [1], [0], [0], [0, 0, 1, 0], [], []>} : vector<8x16xbf16>, vector<8x16xbf16>, vector<8x8xf32> -> vector<8x8xf32>
    %c0_9 = arith.constant 0 : index
    %c0_10 = arith.constant 0 : index
    %10 = vector.load %arg7[%c0_9, %c0_10] : memref<8x1xf32, #tpu.memory_space<vmem>>, vector<8x1xf32>
    %cst_11 = arith.constant dense<0xFF800000> : vector<8xf32>
    %11 = vector.multi_reduction <maximumf>, %9, %cst_11 [1] : vector<8x8xf32> to vector<8xf32>
    %12 = vector.shape_cast %11 : vector<8xf32> to vector<8x1xf32>
    %13 = arith.maximumf %10, %12 : vector<8x1xf32>
    %14 = arith.subf %10, %13 : vector<8x1xf32>
    %15 = math.exp %14 : vector<8x1xf32>
    %16 = vector.broadcast %13 : vector<8x1xf32> to vector<8x8xf32>
    %17 = arith.subf %9, %16 : vector<8x8xf32>
    %18 = math.exp %17 : vector<8x8xf32>
    %c0_12 = arith.constant 0 : index
    %c0_13 = arith.constant 0 : index
    %19 = vector.load %arg8[%c0_12, %c0_13] : memref<8x1xf32, #tpu.memory_space<vmem>>, vector<8x1xf32>
    %20 = arith.mulf %15, %19 : vector<8x1xf32>
    %cst_14 = arith.constant dense<0.000000e+00> : vector<8xf32>
    %21 = vector.multi_reduction <add>, %18, %cst_14 [1] : vector<8x8xf32> to vector<8xf32>
    %22 = vector.shape_cast %21 : vector<8xf32> to vector<8x1xf32>
    %23 = arith.addf %20, %22 : vector<8x1xf32>
    %c0_15 = arith.constant 0 : index
    %c0_16 = arith.constant 0 : index
    %24 = vector.load %arg8[%c0_15, %c0_16] : memref<8x1xf32, #tpu.memory_space<vmem>>, vector<8x1xf32>
    tpu.vector_store %arg8[%c0_15, %c0_16], %23 {strides = array<i32>} : memref<8x1xf32, #tpu.memory_space<vmem>>, vector<8x1xf32>,
    %c0_17 = arith.constant 0 : index
    %c0_18 = arith.constant 0 : index
    %25 = vector.load %arg9[%c0_17, %c0_18] : memref<8x16xf32, #tpu.memory_space<vmem>>, vector<8x16xf32>
    %26 = vector.broadcast %15 : vector<8x1xf32> to vector<8x16xf32>
    %27 = arith.mulf %26, %25 : vector<8x16xf32>
    %28 = arith.truncf %18 : vector<8x8xf32> to vector<8x8xbf16>
    %cst_19 = arith.constant dense<0.000000e+00> : vector<8x16xf32>
    %29 = tpu.matmul %28, %8, %cst_19 {dimension_numbers = #tpu.dot_dimension_numbers<[1], [0], [0], [1], [0, 0, 1, 1], [], []>} : vector<8x8xbf16>, vector<8x16xbf16>, vector<8x16xf32> -> vector<8x16xf32>
    %30 = arith.addf %27, %29 : vector<8x16xf32>
    %c0_20 = arith.constant 0 : index
    %c0_21 = arith.constant 0 : index
    %31 = vector.load %arg9[%c0_20, %c0_21] : memref<8x16xf32, #tpu.memory_space<vmem>>, vector<8x16xf32>
    tpu.vector_store %arg9[%c0_20, %c0_21], %30 {strides = array<i32>} : memref<8x16xf32, #tpu.memory_space<vmem>>, vector<8x16xf32>,
    %c0_22 = arith.constant 0 : index
    %c0_23 = arith.constant 0 : index
    %32 = vector.load %arg7[%c0_22, %c0_23] : memref<8x1xf32, #tpu.memory_space<vmem>>, vector<8x1xf32>
    tpu.vector_store %arg7[%c0_22, %c0_23], %13 {strides = array<i32>} : memref<8x1xf32, #tpu.memory_space<vmem>>, vector<8x1xf32>,
    %c0_i32_24 = arith.constant 0 : i32
    %33 = arith.cmpi eq, %arg2, %c0_i32_24 : i32
    %34 = arith.extui %33 : i1 to i32
    %c0_i32_25 = arith.constant 0 : i32
    %35 = arith.cmpi ne, %34, %c0_i32_25 : i32
    scf.if %35 {
      %c0_26 = arith.constant 0 : index
      %c0_27 = arith.constant 0 : index
      %36 = vector.load %arg8[%c0_26, %c0_27] : memref<8x1xf32, #tpu.memory_space<vmem>>, vector<8x1xf32>
      %37 = tpu.reciprocal %36 {approx = true} : vector<8x1xf32> -> vector<8x1xf32>
      %c0_28 = arith.constant 0 : index
      %c0_29 = arith.constant 0 : index
      %38 = vector.load %arg9[%c0_28, %c0_29] : memref<8x16xf32, #tpu.memory_space<vmem>>, vector<8x16xf32>
      %39 = vector.broadcast %37 : vector<8x1xf32> to vector<8x16xf32>
      %40 = arith.mulf %38, %39 : vector<8x16xf32>
      %41 = arith.truncf %40 : vector<8x16xf32> to vector<8x16xbf16>
      %c0_30 = arith.constant 0 : index
      %c0_31 = arith.constant 0 : index
      %c0_32 = arith.constant 0 : index
      %42 = vector.load %arg6[%c0_30, %c0_31, %c0_32] : memref<1x8x16xbf16, #tpu.memory_space<vmem>>, vector<1x8x16xbf16>
      %43 = vector.shape_cast %42 : vector<1x8x16xbf16> to vector<8x16xbf16>
      %44 = vector.shape_cast %41 : vector<8x16xbf16> to vector<1x8x16xbf16>
      tpu.vector_store %arg6[%c0_30, %c0_31, %c0_32], %44 {strides = array<i32>} : memref<1x8x16xbf16, #tpu.memory_space<vmem>>, vector<1x8x16xbf16>,
    } else {
    }
    return
  }
  func.func @transform_0(%arg0: i32, %arg1: i32, %arg2: i32) -> (i32, i32, i32) {
    %c0_i32 = arith.constant 0 : i32
    %c0_i32_0 = arith.constant 0 : i32
    return %arg0, %arg1, %c0_i32 : i32, i32, i32
  }
  func.func @transform_1(%arg0: i32, %arg1: i32, %arg2: i32) -> (i32, i32, i32) {
    %c0_i32 = arith.constant 0 : i32
    %c0_i32_0 = arith.constant 0 : i32
    return %arg0, %arg2, %c0_i32 : i32, i32, i32
  }
  func.func @transform_2(%arg0: i32, %arg1: i32, %arg2: i32) -> (i32, i32, i32) {
    %c0_i32 = arith.constant 0 : i32
    %c0_i32_0 = arith.constant 0 : i32
    return %arg0, %arg2, %c0_i32 : i32, i32, i32
  }
  func.func @transform_3(%arg0: i32, %arg1: i32, %arg2: i32) -> (i32, i32, i32) {
    %c0_i32 = arith.constant 0 : i32
    %c0_i32_0 = arith.constant 0 : i32
    return %arg0, %arg1, %c0_i32 : i32, i32, i32
  }
}

</mosaic_0001>

<bundles_post_ra>
// kernel: _lambda_.4
= control target key start
LH: loop header
LB: loop body
LE: loop exit
PB: predicated region body
PF: predicated region fallthrough
CT: control target
= control target key end

     0   :  { %8 = vsyncpa [#allocation3], 0  ;;  %s160_s12 = smov [#allocation2]   ;;  %s211_s0 = inlined_call_operand.hbm [shape: f32[8,32], index: 0, kind: input, shape index: {}]   ;;  %s212_s1 = inlined_call_operand.vmem [shape: bf16[32,32], index: 1, kind: input, shape index: {}]   ;;  %s213_s2 = inlined_call_operand.vmem [shape: f32[1,32], index: 2, kind: input, shape index: {}]   ;;  %s214_s3 = inlined_call_operand.vmem [shape: bf16[2,8,16], index: 3, kind: output, shape index: {}]  }
   0x1   :  { %s15_s13 = sshll.u32 %s160_s12, 4  ;;  %s136_s16 = scalar_lea.hbm %s211_s0, 128  ;;  %s16_s13 = int_to_ptr.vmem [resolvable:$true] %s15_s13 }
   0x2   :  { %p137_p0 = scmp.ne.s32.totalorder %s211_s0, %s136_s16  ;;  %p140_p1 = scmp.lt.u32.totalorder %s136_s16, %s211_s0 }
   0x4   :  { %p142_p2 = pnand %p140_p1, %p137_p0 }
   0x6   :  { %145 = shalt.err (!%p142_p2)
}
   0x7   :  { %s146_s21 = scalar_lea.vmem %s16_s13, 128  ;;  %p151_p4 = scmp.lt.s32.totalorder %s16_s13, %s16_s13 }
   0x8   :  { %p147_p3 = scmp.ne.s32.totalorder %s16_s13, %s146_s21  ;;  %p152_p5 = scmp.lt.s32.totalorder %s146_s21, %s146_s21 }
   0xa   :  { %p153_p6 = por %p152_p5, %p151_p4 }
   0xc   :  { %p154_p7 = pnand %p153_p6, %p147_p3 }
   0xe   :  { %157 = shalt.err (!%p154_p7)
}
   0xf   :  { %18 = dma.hbm_to_vmem [thread:$0]  %s211_s0, 128, %s16_s13, [#allocation3]  }
  0x10   :  { %158 = dma.done.wait [#allocation3], 128  }
  0x11   :  { %159 = vsyncadd [#allocation3], 4294967168  ;;  %v161_v0 = vmov 0.0   ;;  %vm162_vm0 = vmmov 0   ;;  %v134_v1 = vld [vmem:[%s212_s1] sm:$0xff]   ;;  %v135_v2 = vld [vmem:[%s212_s1 + $0x8] sm:$0xff]  }
  0x12   :  { %122 = vmatprep.subr.bf16.mxu0 %v161_v0  ;;  %126 = vmatprep.mubr.msk.bf16.mxu0 %vm162_vm0, %v161_v0  ;;  %v27_v3 = vld [vmem:[#allocation2] sm:$0xff]  ;;  %vm52_vm1 = vcmask 261120   ;;  %vm97_vm2 = vcmask 125952   ;;  %s163_s29 = smov 112  }
  0x13   :  { %123 = vmatpush3.bf16.msra.mxu0 %v134_v1  ;;  %v28_v4 = vpack.c.bf16 %v27_v3, %v27_v3  ;;  %v112_v5 = vld [vmem:[%s213_s2] ss:$0 sm:$0xff] }
  0x14   :  { %124 = vmatprep.subr.bf16.mxu0 %v161_v0 }
  0x17   :  { %125 = vmatpush3.bf16.msra.mxu0 %v135_v2 }
  0x1a   :  { %127 = vmatmul.mubr.msk.bf16.vlgmr.msra.gmra.mrb[0].mxu0 %vm52_vm1, %v28_v4 }
  0xed   :  { %v90_v6 = vpop.f32.mrb[0].mxu0 }
  0xee   :  { %v91_v7 = vadd.f32 %v112_v5, %v90_v6  ;;  %v128_v8 = vpop.f32.mrb[1].mxu0 }
  0xef   :  { %v93_v9 = vpop.f32.mrb[2].mxu0 }
  0xf0   :  { %v96_v10 = vpack.c.bf16 %v91_v7, %v91_v7  ;;  %v129_v11 = vpop.f32.mrb[3].mxu0 }
  0xf2   :  { %102 = vrot.lane.b32.xlu0 %v96_v10, %s163_s29  ;;  %98 = vst.msk [vmem:[%s214_s3] sm:$0xf] %vm97_vm2, %v96_v10 }
 0x164   :  { %v103_v12 = vpop.permute.xlu0 %102 }
 0x165   :  { %117 = vst.msk [vmem:[%s214_s3 + $0x4] sm:$0xf] %vm97_vm2, %v103_v12 }
 0x166   :  { %111 = vsyncpa [#allocation3], 1 }

// kernel: _lambda_.7
= control target key start
LH: loop header
LB: loop body
LE: loop exit
PB: predicated region body
PF: predicated region fallthrough
CT: control target
= control target key end

     0   :  { %v200_v1 = vmov 0.0   ;;  %vm201_vm0 = vmmov 0   ;;  %vm30_vm1 = vcmask 130048   ;;  %s250_s0 = inlined_call_operand.vmem [shape: bf16[2,8,16], index: 0, kind: input, shape index: {}]   ;;  %s251_s1 = inlined_call_operand.vmem [shape: bf16[2,16,32], index: 1, kind: input, shape index: {}]   ;;  %s252_s2 = inlined_call_operand.vmem [shape: f32[1,32], index: 2, kind: input, shape index: {}]   ;;  %s253_s3 = inlined_call_operand.hbm [shape: f32[8,32], index: 3, kind: output, shape index: {}]  }
   0x1   :  { %v174_v0 = vld [vmem:[%s251_s1 + $0x8] sm:$0xff]   ;;  %159 = vmatprep.subr.bf16.mxu0 %v200_v1  ;;  %165 = vmatprep.subr.bf16.mxu1 %v200_v1  ;;  %v175_v2 = vld [vmem:[%s251_s1] sm:$0xff]  }
   0x2   :  { %160 = vmatpush3.bf16.msra.mxu0 %v174_v0  ;;  %161 = vmatprep.mubr.msk.bf16.mxu0 %vm201_vm0, %v200_v1  ;;  %v147_v3 = vld [vmem:[%s250_s0 + $0x4] sm:$0xf]  ;;  %v16_v4 = vld [vmem:[%s250_s0] sm:$0xf] }
   0x3   :  { %166 = vmatpush3.bf16.msra.mxu1 %v175_v2  ;;  %167 = vmatprep.mubr.msk.bf16.mxu1 %vm201_vm0, %v200_v1 }
   0x4   :  { %8 = vsyncpa [#allocation3], 0  ;;  %v154_v7 = vld [vmem:[%s252_s2] ss:$0 sm:$0xff]  ;;  %s202_s21 = smov [#allocation2]   ;;  %vm131_vm2 = vcmask 261120  }
   0x5   :  { %162 = vmatmul.mubr.msk.bf16.vlgmr.msra.gmra.mrb[0].mxu0 %vm30_vm1, %v147_v3  ;;  %s139_s22 = sshll.u32 %s202_s21, 4  ;;  %s140_s22 = int_to_ptr.vmem [resolvable:$true] %s139_s22 }
   0x6   :  { %168 = vmatmul.mubr.msk.bf16.vlgmr.msra.gmra.mrb[0].mxu1 %vm30_vm1, %v16_v4  ;;  %s176_s0 = scalar_lea.vmem %s140_s22, 128  ;;  %p181_p1 = scmp.lt.s32.totalorder %s140_s22, %s140_s22 }
   0x7   :  { %p177_p0 = scmp.ne.s32.totalorder %s140_s22, %s176_s0  ;;  %p182_p2 = scmp.lt.s32.totalorder %s176_s0, %s176_s0 }
   0x9   :  { %p183_p3 = por %p182_p2, %p181_p1 }
   0xb   :  { %p184_p4 = pnand %p183_p3, %p177_p0 }
  0xd8   :  { %v68_v5 = vpop.f32.mrb[0].mxu0 }
  0xd9   :  { %v117_v6 = vpop.f32.mrb[0].mxu1  ;;  %v163_v8 = vpop.f32.mrb[1].mxu0 }
  0xda   :  { %v118_v9 = vadd.f32 %v117_v6, %v68_v5  ;;  %v169_v10 = vpop.f32.mrb[1].mxu1  ;;  %v71_v11 = vpop.f32.mrb[2].mxu0 }
  0xdb   :  { %v120_v12 = vpop.f32.mrb[2].mxu1  ;;  %v164_v13 = vpop.f32.mrb[3].mxu0 }
  0xdc   :  { %v130_v14 = vadd.f32 %v154_v7, %v118_v9  ;;  %v170_v15 = vpop.f32.mrb[3].mxu1 }
  0xde   :  { %132 = vst.msk [vmem:[#allocation2] sm:$0xff] %vm131_vm2, %v130_v14 }
  0xdf   :  { %187 = shalt.err (!%p184_p4)
}
  0xe0   :  { %s188_s24 = scalar_lea.hbm %s253_s3, 128 }
  0xe1   :  { %p189_p5 = scmp.ne.s32.totalorder %s253_s3, %s188_s24  ;;  %p192_p6 = scmp.lt.u32.totalorder %s188_s24, %s253_s3 }
  0xe3   :  { %p194_p7 = pnand %p192_p6, %p189_p5 }
  0xe5   :  { %197 = shalt.err (!%p194_p7)
}
  0xe6   :  { %142 = dma.vmem_to_hbm [thread:$0]  %s140_s22, 128, %s253_s3, [#allocation3]  }
  0xe7   :  { %198 = dma.done.wait [#allocation3], 128  }
  0xe8   :  { %199 = vsyncadd [#allocation3], 4294967168 }
  0xe9   :  { %146 = vsyncpa [#allocation3], 1 }

// kernel: _lambda_.5
= control target key start
LH: loop header
LB: loop body
LE: loop exit
PB: predicated region body
PF: predicated region fallthrough
CT: control target
= control target key end

     0   :  { %13 = vsyncpa [#allocation3], 0  ;;  %s273_s24 = smov [#allocation2]   ;;  %s366_s0 = inlined_call_operand.vmem [shape: f32[8,32], index: 0, kind: input, shape index: {}]   ;;  %s367_s1 = inlined_call_operand.hbm [shape: f32[8,32], index: 1, kind: input, shape index: {}]   ;;  %s368_s2 = inlined_call_operand.vmem [shape: bf16[32,32], index: 2, kind: input, shape index: {}]   ;;  %s369_s3 = inlined_call_operand.vmem [shape: f32[1,32], index: 3, kind: input, shape index: {}]   ;;  %s370_s4 = inlined_call_operand.vmem [shape: bf16[32,32], index: 4, kind: input, shape index: {}]   ;;  %s371_s5 = inlined_call_operand.vmem [shape: f32[1,32], index: 5, kind: input, shape index: {}]   ;;  %s372_s6 = inlined_call_operand.vmem [shape: bf16[2,8,16], index: 6, kind: output, shape index: {0}]   ;;  %s373_s7 = inlined_call_operand.vmem [shape: bf16[2,8,16], index: 7, kind: output, shape index: {1}]  }
   0x1   :  { %s22_s25 = sshll.u32 %s273_s24, 4  ;;  %s249_s28 = scalar_lea.hbm %s367_s1, 128  ;;  %s23_s25 = int_to_ptr.vmem [resolvable:$true] %s22_s25 }
   0x2   :  { %p250_p0 = scmp.ne.s32.totalorder %s367_s1, %s249_s28  ;;  %p253_p1 = scmp.lt.u32.totalorder %s249_s28, %s367_s1 }
   0x4   :  { %p255_p2 = pnand %p253_p1, %p250_p0 }
   0x6   :  { %258 = shalt.err (!%p255_p2)
}
   0x7   :  { %s259_s10 = scalar_lea.vmem %s23_s25, 128  ;;  %p264_p4 = scmp.lt.s32.totalorder %s23_s25, %s23_s25 }
   0x8   :  { %p260_p3 = scmp.ne.s32.totalorder %s23_s25, %s259_s10  ;;  %p265_p5 = scmp.lt.s32.totalorder %s259_s10, %s259_s10 }
   0xa   :  { %p266_p6 = por %p265_p5, %p264_p4 }
   0xc   :  { %p267_p7 = pnand %p266_p6, %p260_p3 }
   0xe   :  { %270 = shalt.err (!%p267_p7)
}
   0xf   :  { %25 = dma.hbm_to_vmem [thread:$0]  %s367_s1, 128, %s23_s25, [#allocation3]  }
  0x10   :  { %271 = dma.done.wait [#allocation3], 128  }
  0x11   :  { %272 = vsyncadd [#allocation3], 4294967168  ;;  %v274_v0 = vmov 0.0   ;;  %vm275_vm0 = vmmov 0   ;;  %v245_v1 = vld [vmem:[%s368_s2] sm:$0xff]   ;;  %v247_v3 = vld [vmem:[%s368_s2 + $0x8] sm:$0xff]  }
  0x12   :  { %225 = vmatprep.subr.bf16.mxu0 %v274_v0  ;;  %233 = vmatprep.subr.bf16.mxu1 %v274_v0  ;;  %v246_v2 = vld [vmem:[%s370_s4] sm:$0xff]   ;;  %v248_v4 = vld [vmem:[%s370_s4 + $0x8] sm:$0xff]   ;;  %vm65_vm1 = vcmask 261120   ;;  %vm176_vm2 = vcmask 125952   ;;  %s276_s4 = smov 112  }
  0x13   :  { %229 = vmatprep.mubr.msk.bf16.mxu0 %vm275_vm0, %v274_v0  ;;  %237 = vmatprep.mubr.msk.bf16.mxu1 %vm275_vm0, %v274_v0  ;;  %v38_v5 = vld [vmem:[%s366_s0] sm:$0xff] }
  0x14   :  { %226 = vmatpush3.bf16.msra.mxu0 %v245_v1  ;;  %234 = vmatpush3.bf16.msra.mxu1 %v246_v2  ;;  %v40_v6 = vld [vmem:[#allocation2] sm:$0xff]  ;;  %v39_v7 = vpack.c.bf16 %v38_v5, %v38_v5 }
  0x15   :  { %227 = vmatprep.subr.bf16.mxu0 %v274_v0  ;;  %235 = vmatprep.subr.bf16.mxu1 %v274_v0  ;;  %v41_v8 = vpack.c.bf16 %v40_v6, %v40_v6  ;;  %v205_v9 = vld [vmem:[%s369_s3] ss:$0 sm:$0xff] }
  0x16   :  { %v209_v10 = vld [vmem:[%s371_s5] ss:$0 sm:$0xff] }
  0x18   :  { %228 = vmatpush3.bf16.msra.mxu0 %v247_v3  ;;  %236 = vmatpush3.bf16.msra.mxu1 %v248_v4 }
  0x1b   :  { %230 = vmatmul.mubr.msk.bf16.vlgmr.msra.gmra.mrb[0].mxu0 %vm65_vm1, %v39_v7  ;;  %238 = vmatmul.mubr.msk.bf16.vlgmr.msra.gmra.mrb[0].mxu1 %vm65_vm1, %v41_v8 }
  0xee   :  { %v103_v11 = vpop.f32.mrb[0].mxu0  ;;  %v169_v14 = vpop.f32.mrb[0].mxu1 }
  0xef   :  { %v104_v12 = vadd.f32 %v205_v9, %v103_v11  ;;  %v231_v13 = vpop.f32.mrb[1].mxu0  ;;  %v170_v15 = vadd.f32 %v209_v10, %v169_v14  ;;  %v239_v17 = vpop.f32.mrb[1].mxu1 }
  0xf0   :  { %v106_v16 = vpop.f32.mrb[2].mxu0  ;;  %v172_v20 = vpop.f32.mrb[2].mxu1 }
  0xf1   :  { %v175_v18 = vpack.c.bf16 %v104_v12, %v104_v12  ;;  %v232_v19 = vpop.f32.mrb[3].mxu0  ;;  %v178_v21 = vpack.c.bf16 %v170_v15, %v170_v15  ;;  %v240_v22 = vpop.f32.mrb[3].mxu1 }
  0xf3   :  { %177 = vst.msk [vmem:[%s372_s6] sm:$0xf] %vm176_vm2, %v175_v18  ;;  %183 = vrot.lane.b32.xlu0 %v175_v18, %s276_s4  ;;  %179 = vst.msk [vmem:[%s373_s7] sm:$0xf] %vm176_vm2, %v178_v21 }
  0xf7   :  { %191 = vrot.lane.b32.xlu0 %v178_v21, %s276_s4 }
 0x165   :  { %v184_v23 = vpop.permute.xlu0 %183 }
 0x166   :  { %214 = vst.msk [vmem:[%s372_s6 + $0x4] sm:$0xf] %vm176_vm2, %v184_v23 }
 0x169   :  { %v192_v24 = vpop.permute.xlu0 %191 }
 0x16a   :  { %216 = vst.msk [vmem:[%s373_s7 + $0x4] sm:$0xf] %vm176_vm2, %v192_v24 }
 0x16b   :  { %204 = vsyncpa [#allocation3], 1 }

// kernel: _lambda_.6
= control target key start
LH: loop header
LB: loop body
LE: loop exit
PB: predicated region body
PF: predicated region fallthrough
CT: control target
= control target key end

     0   :  { %s638_s12 = smov 0   ;;  %s640_s13 = smov 0   ;;  %s694_s0 = inlined_call_operand.vmem [shape: bf16[2,8,16], index: 0, kind: input, shape index: {}]   ;;  %s695_s1 = inlined_call_operand.vmem [shape: bf16[2,8,16], index: 1, kind: input, shape index: {}]   ;;  %s696_s2 = inlined_call_operand.vmem [shape: bf16[2,8,16], index: 2, kind: input, shape index: {}]   ;;  %s697_s3 = inlined_call_operand.vmem [shape: bf16[2,8,16], index: 3, kind: output, shape index: {}]  }
   0x1   :  { %s642_s14 = smov 0  }
   0x2 LB: > { %s32_s15 = sadd.s32 1, %s608_s13  ;;  %p529_p0 = scmp.ge.s32.totalorder %s612_s14, 1  ;;  %s612_s14 = sphi %s642_s14, %s13_s14   ;;  %s608_s13 = sphi %s640_s13, %s699_s13   ;;  %s604_s12 = sphi %s638_s12, %s698_s12  }
   0x3   : > { %p34_p1 = scmp.ge.s32.totalorder %s32_s15, 2  ;;  %p190_p2 = scmp.lt.s32.totalorder %s612_s14, 3 }
   0x5   : > { %s701_s15 = smov (%p34_p1, %s32_s15), 0  ;;  %p191_p3 = pnand %p529_p0, %p190_p2 }
   0x6   : > { %p232_p4 = scmp.lt.s32.totalorder (!%p191_p3), %s604_s12, 1  ;;  %vm268_vm0 = vcmask (!%p191_p3), 130048   ;;  %v614_v0 = vmov (!%p191_p3), 0.0   ;;  %vm615_vm1 = vmmov (!%p191_p3), 0   ;;  %vm265_vm2 = vcmask (!%p191_p3), 7168  }
   0x7   : > { %194 = sbr.rel (%p191_p3) target bundleno = 823 (0x337), region = 32  ;;  %542 = vmatprep.subr.bf16.mxu0 (!%p191_p3), %v614_v0  ;;  %269 = vst.msk [vmem:[#allocation4] sm:$0xff] (!%p191_p3), %vm268_vm0, %v614_v0  ;;  %544 = vmatprep.mubr.msk.bf16.mxu0 (!%p191_p3), %vm615_vm1, %v614_v0  ;;  %v616_v4 = vmov (!%p191_p3), -inf   ;;  %vm321_vm3 = vcmask (!%p191_p3), 64512   ;;  %v617_v10 = vmov (!%p191_p3), 0   ;;  %vm356_vm4 = vcmask (!%p191_p3), 1043456  }
   0x8   : > { %548 = vmatprep.subr.bf16.mxu1 (!%p191_p3), %v614_v0  ;;  %550 = vmatprep.mubr.msk.bf16.mxu1 (!%p191_p3), %vm615_vm1, %v614_v0  ;;  %266 = vst.msk [vmem:[#allocation2] sm:$0xff] (!%p191_p3), %vm265_vm2, %v616_v4  ;;  %267 = vst.msk [vmem:[#allocation3] sm:$0xff] (!%p191_p3), %vm265_vm2, %v614_v0  ;;  %vm416_vm5 = vcmask (!%p191_p3), 125952  }
   0x9   : > { %582 = vset.pattern.permute.xlu0 (!%p191_p3), %v617_v10  ;;  %583 = vset.pattern.permute.xlu1 (!%p191_p3), %v617_v10 }
   0xe   : > { %s703_s12 = smov (!%p232_p4, %s604_s12), 1  ;;  %v345_v31 = vld [vmem:[#allocation4] sm:$0xff] }
   0xf   : > { %s657_s16 = sshll.u32 %s703_s12, 2  ;;  %v320_v11 = vld [vmem:[#allocation2] sm:$0xff]  ;;  %v337_v25 = vld [vmem:[#allocation3] sm:$0xff] }
  0x10   : > { %s245_s19 = scalar_lea.vmem %s695_s1, %s657_s16  ;;  %s238_s22 = scalar_lea.vmem %s694_s0, %s657_s16 }
  0x11   : > { %v271_v1 = vld [vmem:[%s245_s19] sm:$0xf]  ;;  %s252_s25 = scalar_lea.vmem %s696_s2, %s657_s16  ;;  %s259_s28 = scalar_lea.vmem %s697_s3, %s657_s16 }
  0x12   : > { %v278_v2 = vsel %vm268_vm0, %v271_v1, 0  ;;  %v270_v3 = vld [vmem:[%s238_s22] sm:$0xf] }
  0x13   : > { %543 = vmatpush3.bf16.xpose.msra.mxu0 %v278_v2  ;;  %v272_v15 = vld [vmem:[%s252_s25] sm:$0xf] }
  0x14   : > { %v358_v16 = vsel %vm356_vm4, %v272_v15, 0 }
  0x15   : > { %549 = vmatpush3.bf16.msra.mxu1 %v358_v16 }
  0x1a   : > { %545 = vmatmul.mubr.msk.bf16.vlgmr.msra.gmra.mrb[0].mxu0 %vm268_vm0, %v270_v3 }
  0xed   : > { %v314_v5 = vpop.f32.mrb[0].mxu0 }
  0xee   : > { %v546_v6 = vpop.f32.mrb[1].mxu0  ;;  %v322_v7 = vsel %vm321_vm3, %v314_v5, -inf }
  0xef   : > { %323 = vmax.xlane.f32.xlu0 %v322_v7  ;;  %v317_v8 = vpop.f32.mrb[2].mxu0 }
  0xf0   : > { %v547_v9 = vpop.f32.mrb[3].mxu0 }
 0x17c   : > { %v324_v12 = vpop.xlane.xlu0 %323 }
 0x17d   : > { %v325_v13 = vmax.f32 %v320_v11, %v324_v12 }
 0x17f   : > { %v326_v14 = vsub.f32 %v320_v11, %v325_v13  ;;  %402 = vst.msk [vmem:[#allocation2] sm:$0xff] %vm265_vm2, %v325_v13  ;;  %331 = vperm.xlu0 %582, %v325_v13  }
 0x181   : > { %v327_v23 = vmul.f32 1.442695, %v326_v14 }
 0x1fe   : > { %v332_v17 = vpop.permute.xlu0 %331 }
 0x1ff   : > { %v334_v18 = vsub.f32 %v314_v5, %v332_v17 }
 0x201   : > { %v335_v19 = vmul.f32 1.442695, %v334_v18 }
 0x203   : > { %584 = vpow2.f32 %v335_v19 }
 0x204   : > { %586 = vpow2.f32 %v327_v23 }
 0x20d   : > { %v585_v20 = vpop.eup %584 }
 0x20e   : > { %v339_v21 = vsel %vm321_vm3, %v585_v20, 0.0  ;;  %v352_v22 = vpack.c.bf16 %v585_v20, %v585_v20  ;;  %v587_v24 = vpop.eup %586 }
 0x20f   : > { %340 = vadd.xlane.f32.xlu1 %v339_v21  ;;  %v338_v26 = vmul.f32 %v587_v24, %v337_v25 }
 0x210   : > { %551 = vmatmul.mubr.msk.bf16.vlgmr.msra.gmra.mrb[0].mxu1 %vm321_vm3, %v352_v22 }
 0x220   : > { %348 = vperm.xlu1 %583, %v587_v24  }
 0x29c   : > { %v341_v27 = vpop.xlane.xlu1 %340 }
 0x29d   : > { %v342_v28 = vadd.f32 %v341_v27, %v338_v26 }
 0x29f   : > { %344 = vst.msk [vmem:[#allocation3] sm:$0xff] %vm265_vm2, %v342_v28 }
 0x2a0   : > { %v349_v32 = vpop.permute.xlu1 %348 }
 0x2a1   : > { %v351_v33 = vmul.f32 %v349_v32, %v345_v31 }
 0x2a6   : > { %v406_v29 = vld [vmem:[#allocation3] sm:$0xff] }
 0x2a7   : > { %588 = vrcp.f32 %v406_v29 }
 0x2b1   : > { %v589_v30 = vpop.eup %588 }
 0x2b2   : > { %411 = vperm.xlu1 %583, %v589_v30  }
 0x2e3   : > { %v394_v34 = vpop.f32.mrb[0].mxu1 }
 0x2e4   : > { %v400_v35 = vadd.f32 %v394_v34, %v351_v33  ;;  %v552_v36 = vpop.f32.mrb[1].mxu1 }
 0x2e5   : > { %v397_v37 = vpop.f32.mrb[2].mxu1 }
 0x2e6   : > { %401 = vst.msk [vmem:[#allocation4] sm:$0xff] %vm268_vm0, %v400_v35  ;;  %v553_v38 = vpop.f32.mrb[3].mxu1 }
 0x2ed   : > { %v408_v39 = vld [vmem:[#allocation4] sm:$0xff] }
 0x331   : > { %v412_v40 = vpop.permute.xlu1 %411 }
 0x332   : > { %v414_v41 = vmul.f32 %v412_v40, %v408_v39 }
 0x334   : > { %v415_v42 = vpack.c.bf16 %v414_v41, %v414_v41 }
 0x336   : > { %417 = vst.msk [vmem:[%s259_s28] sm:$0xf] %vm416_vm5, %v415_v42 }
 0x337 PF: > { %s13_s14 = sadd.s32 1, %s612_s14   ;;  %s698_s12 = smov %s608_s13 }
 0x338   : > { %p10_p5 = scmp.ge.s32.totalorder %s13_s14, 4   ;;  %s699_s13 = smov %s701_s15 }
 0x33a   :  { %12 = sbr.rel (!%p10_p5) target bundleno = 2 (0x2), region = 76 }

</bundles_post_ra>
